<compile_context>
chip_gen: v5e
topology: v5e:2x2
jax: 0.10.0
libtpu: 0.0.40
codegen_flags: <defaults>
</compile_context>

<pallas_src>
import functools

import jax
import jax.numpy as jnp
from jax.experimental import pallas as pl
from jax.experimental.pallas import tpu as pltpu


# ---------------------------------------------------------------------------
# helpers
# ---------------------------------------------------------------------------
def _round_up(x, m):
    return ((x + m - 1) // m) * m


def _pad2d(a, rows, cols):
    r, c = a.shape
    return jnp.pad(a, ((0, rows - r), (0, cols - c)))


def _detect_vmem_capacity():
    try:
        return int(pltpu.get_tpu_info().vmem_capacity_bytes)
    except Exception:
        return 64 << 20  # conservative (v7x-sized) fallback


_VMEM_CAP = _detect_vmem_capacity()


def _choose_tm(batch, vmem_cap):
    """Batch tile.  Multiple of 16 (bf16 sublane packing)."""
    big = 512 if vmem_cap >= (100 << 20) else 256  # v5e/v6e: 128 MiB; v7x: 64 MiB
    if batch <= 16:
        return batch                      # one step; block == full batch, no pad
    # >= 2 grid steps so both v7x TensorCores get work at mid-size batches.
    half = _round_up(-(-batch // 2), 16)
    return min(big, half)


# ---------------------------------------------------------------------------
# Fused MLP Pallas kernel
#   refs = (x, w_0, ..., w_{L-1}, w_final, shifts, out)
#   shifts is a stacked (L+1, F_max) f32 array: rows 0..L-1 = folded BN shifts,
#   row L = final linear bias.
# ---------------------------------------------------------------------------
def _make_fused_mlp_kernel(hidden_pads, out_dim):
    num_hidden = len(hidden_pads)

    def kernel(*refs):
        x_ref = refs[0]
        w_refs = refs[1:1 + num_hidden]
        wf_ref = refs[1 + num_hidden]
        shifts_ref = refs[2 + num_hidden]
        o_ref = refs[-1]

        shifts = shifts_ref[...]                     # (L+1, F_max) f32
        h = x_ref[...].astype(jnp.float32)           # (TM, D_in)
        for i in range(num_hidden):
            w = w_refs[i][...]                       # (prev, H_pad_i), BN folded
            z = jnp.dot(h.astype(w.dtype), w,
                        preferred_element_type=jnp.float32)
            z = z + shifts[i:i + 1, :hidden_pads[i]]
            h = jnp.maximum(z, 0.0)                  # ReLU; Dropout = identity (eval)
        wf = wf_ref[...]                             # (prev, out_dim)
        y = jnp.dot(h.astype(wf.dtype), wf,
                    preferred_element_type=jnp.float32)
        y = y + shifts[num_hidden:num_hidden + 1, :out_dim]
        o_ref[...] = y.astype(o_ref.dtype)

    return kernel


# ---------------------------------------------------------------------------
# Parameter init (matches nn.Linear / nn.BatchNorm1d shapes)
# ---------------------------------------------------------------------------
def init_modality_encoder_raw(key, input_dim, hidden_dims, output_dim):
    eps = 1e-5
    raw = {"hidden": [], "final": None}
    prev = input_dim
    for h in hidden_dims:
        key, kw, kb, kg, kbeta, km, kv = jax.random.split(key, 7)
        w = jax.random.normal(kw, (prev, h), jnp.float32) * (1.0 / jnp.sqrt(prev))
        b = jax.random.normal(kb, (1, h), jnp.float32) * 0.01
        gamma = 1.0 + 0.1 * jax.random.normal(kg, (1, h), jnp.float32)
        beta = 0.1 * jax.random.normal(kbeta, (1, h), jnp.float32)
        run_mean = 0.1 * jax.random.normal(km, (1, h), jnp.float32)
        run_var = 1.0 + 0.1 * jax.random.uniform(kv, (1, h), jnp.float32)
        raw["hidden"].append({"w": w, "b": b, "gamma": gamma, "beta": beta,
                              "mean": run_mean, "var": run_var, "eps": eps})
        prev = h
    key, kw, kb = jax.random.split(key, 3)
    wf = jax.random.normal(kw, (prev, output_dim), jnp.float32) * (1.0 / jnp.sqrt(prev))
    bf = jax.random.normal(kb, (1, output_dim), jnp.float32) * 0.01
    raw["final"] = {"w": wf, "b": bf}
    return raw


# ---------------------------------------------------------------------------
# Fold BN into Linear, pad hidden dims to 128 lanes, stack shifts.
#   - first weight keeps its true input_dim rows  -> x needs no feature pad
#   - final weight keeps its true output_dim cols -> no output column slice
# ---------------------------------------------------------------------------
def fold_and_pad(raw, param_dtype=jnp.float32):
    hidden, final = raw["hidden"], raw["final"]
    num_hidden = len(hidden)
    in_dim = hidden[0]["w"].shape[0] if num_hidden else final["w"].shape[0]
    out_dim = final["w"].shape[1]
    hpads = [_round_up(l["w"].shape[1], 128) for l in hidden]

    ws, shift_rows = [], []
    prev_rows = in_dim
    for li, layer in enumerate(hidden):
        scale = layer["gamma"] / jnp.sqrt(layer["var"] + layer["eps"])
        w_f = layer["w"] * scale                                  # (prev, h)
        s_f = layer["b"] * scale + (layer["beta"] - layer["mean"] * scale)
        ws.append(_pad2d(w_f, prev_rows, hpads[li]).astype(param_dtype))
        shift_rows.append(s_f)
        prev_rows = hpads[li]
    wf = _pad2d(final["w"], prev_rows, out_dim).astype(param_dtype)

    fmax = _round_up(max(hpads + [out_dim]), 128)
    packed = [jnp.pad(s, ((0, 0), (0, fmax - s.shape[1]))) for s in shift_rows]
    packed.append(jnp.pad(final["b"], ((0, 0), (0, fmax - out_dim))))
    shifts = jnp.concatenate(packed, axis=0).astype(jnp.float32)  # (L+1, F_max)

    return tuple(ws), wf, shifts


# ---------------------------------------------------------------------------
# Forward: one fused pallas_call, grid over batch tiles
# ---------------------------------------------------------------------------
@functools.partial(jax.jit, static_argnames=("single_buffer",))
def modality_encoder_forward(padded_params, x, *, single_buffer=True):
    ws, wf, shifts = padded_params
    num_hidden = len(ws)
    B, D = x.shape
    out_dim = int(wf.shape[1])
    hidden_pads = tuple(int(w.shape[1]) for w in ws)

    vmem_cap = _VMEM_CAP
    TM = _choose_tm(B, vmem_cap)
    B_pad = _round_up(B, TM)
    x_in = x if B_pad == B else jnp.pad(x, ((0, B_pad - B), (0, 0)))

    def resident_spec(shape):
        # Constant index_map -> block is resident across the whole grid;
        # single-buffer it so it doesn't cost 2x VMEM.
        if single_buffer:
            try:
                return pl.BlockSpec(shape, lambda i: (0, 0),
                                    pipeline_mode=pl.Buffered(1))
            except TypeError:
                pass
        return pl.BlockSpec(shape, lambda i: (0, 0))

    in_specs = [pl.BlockSpec((TM, D), lambda i: (i, 0))]
    in_specs += [resident_spec(tuple(w.shape)) for w in ws]
    in_specs += [resident_spec(tuple(wf.shape)),
                 resident_spec(tuple(shifts.shape))]
    out_spec = pl.BlockSpec((TM, out_dim), lambda i: (i, 0))

    # --- VMEM budget: resident params (x buffer count) + double-buffered I/O
    #     tiles + live hidden activations, capped at ~60% of physical VMEM. ---
    wbuf = 1 if single_buffer else 2
    param_bytes = (sum(int(p.size) * p.dtype.itemsize for p in (*ws, wf))
                   + int(shifts.size) * shifts.dtype.itemsize) * wbuf
    io_bytes = 2 * TM * (D + out_dim) * 4
    max_feat = max(hidden_pads + (out_dim,))
    interm_bytes = 2 * TM * max_feat * 4
    need = param_bytes + io_bytes + interm_bytes + (4 << 20)
    cap = int(0.6 * vmem_cap)  # ~40 MiB on v7x, ~76 MiB on v5e/v6e
    vmem_bytes = int(min(max(need, 16 << 20), cap))
    # TODO(synk): if param_bytes alone exceeds ~60% of VMEM, switch to a weight-
    # streaming path (memory_space=pl.ANY + pltpu.emit_pipeline over layers)
    # instead of forcing full residency.

    # --- advisory cost estimate so XLA can schedule around the custom call ---
    flops, prev = 0, D
    for hp in hidden_pads:
        flops += 2 * B_pad * prev * hp
        prev = hp
    flops += 2 * B_pad * prev * out_dim
    bytes_accessed = (int(x_in.size) * x_in.dtype.itemsize
                      + B_pad * out_dim * 4
                      + sum(int(p.size) * p.dtype.itemsize
                            for p in (*ws, wf, shifts)))
    cost = pl.CostEstimate(flops=flops, transcendentals=0,
                           bytes_accessed=bytes_accessed)

    out = pl.pallas_call(
        _make_fused_mlp_kernel(hidden_pads, out_dim),
        out_shape=jax.ShapeDtypeStruct((B_pad, out_dim), jnp.float32),
        grid=(B_pad // TM,),
        in_specs=in_specs,
        out_specs=out_spec,
        compiler_params=pltpu.CompilerParams(
            dimension_semantics=("parallel",),
            vmem_limit_bytes=vmem_bytes,
        ),
        cost_estimate=cost,
    )(x_in, *ws, wf, shifts)

    return out if B_pad == B else out[:B]


# Runtime fallback in case pl.Buffered(1) is rejected by this Mosaic build.
_SINGLE_BUFFER_OK = [True]


def _forward_with_fallback(padded_params, x):
    if _SINGLE_BUFFER_OK[0]:
        try:
            return jax.block_until_ready(
                modality_encoder_forward(padded_params, x, single_buffer=True))
        except Exception:
            _SINGLE_BUFFER_OK[0] = False
    return jax.block_until_ready(
        modality_encoder_forward(padded_params, x, single_buffer=False))


# ---------------------------------------------------------------------------
# Pure-JAX reference (unfolded BN math) for a sanity check
# ---------------------------------------------------------------------------
def modality_encoder_ref(raw_params, x):
    h = x
    for layer in raw_params["hidden"]:
        y = h @ layer["w"] + layer["b"]
        y = (y - layer["mean"]) / jnp.sqrt(layer["var"] + layer["eps"])
        y = y * layer["gamma"] + layer["beta"]
        h = jnp.maximum(y, 0.0)
        # Dropout: identity in eval mode.
    return h @ raw_params["final"]["w"] + raw_params["final"]["b"]


# ---------------------------------------------------------------------------
if __name__ == "__main__":
    key = jax.random.PRNGKey(0)
    kp, kx = jax.random.split(key)

    batch = 8
    input_dim = 32
    hidden_dims = [64, 32]
    output_dim = 16

    raw = init_modality_encoder_raw(kp, input_dim, hidden_dims, output_dim)
    x = jax.random.normal(kx, (batch, input_dim), jnp.float32)
    ref = modality_encoder_ref(raw, x)

    # f32 weight path: strict accuracy check.
    p_f32 = fold_and_pad(raw, jnp.float32)
    out_f32 = _forward_with_fallback(p_f32, x)
    assert out_f32.shape == (batch, output_dim)
    assert jnp.allclose(out_f32, ref, atol=1e-4, rtol=1e-4), "f32 mismatch vs reference"

    # bf16 weight path (MXU fast path on v6e/v7x): looser tolerance.
    p_bf16 = fold_and_pad(raw, jnp.bfloat16)
    out_bf16 = _forward_with_fallback(p_bf16, x)
    assert out_bf16.shape == (batch, output_dim)
    assert jnp.allclose(out_bf16, ref, atol=5e-2, rtol=5e-2), "bf16 mismatch vs reference"

    print("KERNEL_OK")
</pallas_src>

<mosaic_0001>
module attributes {stable_mosaic.version = 11 : i64} {
  func.func @kernel(%arg0: i32, %arg1: memref<8x32xf32, #tpu.memory_space<vmem>>, %arg2: memref<32x128xf32, #tpu.memory_space<vmem>>, %arg3: memref<128x128xf32, #tpu.memory_space<vmem>>, %arg4: memref<128x16xf32, #tpu.memory_space<vmem>>, %arg5: memref<3x128xf32, #tpu.memory_space<vmem>>, %arg6: memref<8x16xf32, #tpu.memory_space<vmem>>) attributes {dimension_semantics = [#tpu.dimension_semantics<parallel>], iteration_bounds = array<i64: 1>, scalar_prefetch = 0 : i64, scratch_operands = 0 : i64, tpu.core_type = #tpu.core_type<tc>, window_params = [{transform_indices = @transform_0, window_bounds = array<i64: 8, 32>}, {pipeline_mode = #tpu.pipeline_mode<synchronous>, transform_indices = @transform_1, window_bounds = array<i64: 32, 128>}, {pipeline_mode = #tpu.pipeline_mode<synchronous>, transform_indices = @transform_2, window_bounds = array<i64: 128, 128>}, {pipeline_mode = #tpu.pipeline_mode<synchronous>, transform_indices = @transform_3, window_bounds = array<i64: 128, 16>}, {pipeline_mode = #tpu.pipeline_mode<synchronous>, transform_indices = @transform_4, window_bounds = array<i64: 3, 128>}, {transform_indices = @transform_5, window_bounds = array<i64: 8, 16>}]} {
    %c0 = arith.constant 0 : index
    %c0_0 = arith.constant 0 : index
    %0 = vector.load %arg5[%c0, %c0_0] : memref<3x128xf32, #tpu.memory_space<vmem>>, vector<3x128xf32>
    %c0_1 = arith.constant 0 : index
    %c0_2 = arith.constant 0 : index
    %1 = vector.load %arg1[%c0_1, %c0_2] : memref<8x32xf32, #tpu.memory_space<vmem>>, vector<8x32xf32>
    %c0_3 = arith.constant 0 : index
    %c0_4 = arith.constant 0 : index
    %2 = vector.load %arg2[%c0_3, %c0_4] : memref<32x128xf32, #tpu.memory_space<vmem>>, vector<32x128xf32>
    %cst = arith.constant dense<0.000000e+00> : vector<8x128xf32>
    %3 = tpu.matmul %1, %2, %cst {dimension_numbers = #tpu.dot_dimension_numbers<[1], [0], [0], [1], [0, 0, 1, 1], [], []>} : vector<8x32xf32>, vector<32x128xf32>, vector<8x128xf32> -> vector<8x128xf32>
    %4 = vector.extract_strided_slice %0 {offsets = [0, 0], sizes = [1, 128], strides = [1, 1]} : vector<3x128xf32> to vector<1x128xf32>
    %5 = vector.broadcast %4 : vector<1x128xf32> to vector<8x128xf32>
    %6 = arith.addf %3, %5 : vector<8x128xf32>
    %cst_5 = arith.constant 0.000000e+00 : f32
    %7 = vector.broadcast %cst_5 : f32 to vector<8x128xf32>
    %8 = arith.maximumf %6, %7 : vector<8x128xf32>
    %c0_6 = arith.constant 0 : index
    %c0_7 = arith.constant 0 : index
    %9 = vector.load %arg3[%c0_6, %c0_7] : memref<128x128xf32, #tpu.memory_space<vmem>>, vector<128x128xf32>
    %cst_8 = arith.constant dense<0.000000e+00> : vector<8x128xf32>
    %10 = tpu.matmul %8, %9, %cst_8 {dimension_numbers = #tpu.dot_dimension_numbers<[1], [0], [0], [1], [0, 0, 1, 1], [], []>} : vector<8x128xf32>, vector<128x128xf32>, vector<8x128xf32> -> vector<8x128xf32>
    %11 = vector.extract_strided_slice %0 {offsets = [1, 0], sizes = [1, 128], strides = [1, 1]} : vector<3x128xf32> to vector<1x128xf32>
    %12 = vector.broadcast %11 : vector<1x128xf32> to vector<8x128xf32>
    %13 = arith.addf %10, %12 : vector<8x128xf32>
    %cst_9 = arith.constant 0.000000e+00 : f32
    %14 = vector.broadcast %cst_9 : f32 to vector<8x128xf32>
    %15 = arith.maximumf %13, %14 : vector<8x128xf32>
    %c0_10 = arith.constant 0 : index
    %c0_11 = arith.constant 0 : index
    %16 = vector.load %arg4[%c0_10, %c0_11] : memref<128x16xf32, #tpu.memory_space<vmem>>, vector<128x16xf32>
    %cst_12 = arith.constant dense<0.000000e+00> : vector<8x16xf32>
    %17 = tpu.matmul %15, %16, %cst_12 {dimension_numbers = #tpu.dot_dimension_numbers<[1], [0], [0], [1], [0, 0, 1, 1], [], []>} : vector<8x128xf32>, vector<128x16xf32>, vector<8x16xf32> -> vector<8x16xf32>
    %18 = vector.extract_strided_slice %0 {offsets = [2, 0], sizes = [1, 16], strides = [1, 1]} : vector<3x128xf32> to vector<1x16xf32>
    %19 = vector.broadcast %18 : vector<1x16xf32> to vector<8x16xf32>
    %20 = arith.addf %17, %19 : vector<8x16xf32>
    %c0_13 = arith.constant 0 : index
    %c0_14 = arith.constant 0 : index
    %21 = vector.load %arg6[%c0_13, %c0_14] : memref<8x16xf32, #tpu.memory_space<vmem>>, vector<8x16xf32>
    tpu.vector_store %arg6[%c0_13, %c0_14], %20 {strides = array<i32>} : memref<8x16xf32, #tpu.memory_space<vmem>>, vector<8x16xf32>,
    return
  }
  func.func @transform_0(%arg0: i32) -> (i32, i32) {
    %c0_i32 = arith.constant 0 : i32
    %c0_i32_0 = arith.constant 0 : i32
    return %arg0, %c0_i32 : i32, i32
  }
  func.func @transform_1(%arg0: i32) -> (i32, i32) {
    %c0_i32 = arith.constant 0 : i32
    %c0_i32_0 = arith.constant 0 : i32
    %c0_i32_1 = arith.constant 0 : i32
    return %c0_i32, %c0_i32_0 : i32, i32
  }
  func.func @transform_2(%arg0: i32) -> (i32, i32) {
    %c0_i32 = arith.constant 0 : i32
    %c0_i32_0 = arith.constant 0 : i32
    %c0_i32_1 = arith.constant 0 : i32
    return %c0_i32, %c0_i32_0 : i32, i32
  }
  func.func @transform_3(%arg0: i32) -> (i32, i32) {
    %c0_i32 = arith.constant 0 : i32
    %c0_i32_0 = arith.constant 0 : i32
    %c0_i32_1 = arith.constant 0 : i32
    return %c0_i32, %c0_i32_0 : i32, i32
  }
  func.func @transform_4(%arg0: i32) -> (i32, i32) {
    %c0_i32 = arith.constant 0 : i32
    %c0_i32_0 = arith.constant 0 : i32
    %c0_i32_1 = arith.constant 0 : i32
    return %c0_i32, %c0_i32_0 : i32, i32
  }
  func.func @transform_5(%arg0: i32) -> (i32, i32) {
    %c0_i32 = arith.constant 0 : i32
    %c0_i32_0 = arith.constant 0 : i32
    return %arg0, %c0_i32 : i32, i32
  }
}

module attributes {stable_mosaic.version = 11 : i64} {
  func.func @kernel(%arg0: i32, %arg1: memref<8x32xf32, #tpu.memory_space<vmem>>, %arg2: memref<32x128xf32, #tpu.memory_space<vmem>>, %arg3: memref<128x128xf32, #tpu.memory_space<vmem>>, %arg4: memref<128x16xf32, #tpu.memory_space<vmem>>, %arg5: memref<3x128xf32, #tpu.memory_space<vmem>>, %arg6: memref<8x16xf32, #tpu.memory_space<vmem>>) attributes {dimension_semantics = [#tpu.dimension_semantics<parallel>], iteration_bounds = array<i64: 1>, scalar_prefetch = 0 : i64, scratch_operands = 0 : i64, tpu.core_type = #tpu.core_type<tc>, window_params = [{transform_indices = @transform_0, window_bounds = array<i64: 8, 32>}, {pipeline_mode = #tpu.pipeline_mode<synchronous>, transform_indices = @transform_1, window_bounds = array<i64: 32, 128>}, {pipeline_mode = #tpu.pipeline_mode<synchronous>, transform_indices = @transform_2, window_bounds = array<i64: 128, 128>}, {pipeline_mode = #tpu.pipeline_mode<synchronous>, transform_indices = @transform_3, window_bounds = array<i64: 128, 16>}, {pipeline_mode = #tpu.pipeline_mode<synchronous>, transform_indices = @transform_4, window_bounds = array<i64: 3, 128>}, {transform_indices = @transform_5, window_bounds = array<i64: 8, 16>}]} {
    %c0 = arith.constant 0 : index
    %c0_0 = arith.constant 0 : index
    %0 = vector.load %arg5[%c0, %c0_0] : memref<3x128xf32, #tpu.memory_space<vmem>>, vector<3x128xf32>
    %c0_1 = arith.constant 0 : index
    %c0_2 = arith.constant 0 : index
    %1 = vector.load %arg1[%c0_1, %c0_2] : memref<8x32xf32, #tpu.memory_space<vmem>>, vector<8x32xf32>
    %c0_3 = arith.constant 0 : index
    %c0_4 = arith.constant 0 : index
    %2 = vector.load %arg2[%c0_3, %c0_4] : memref<32x128xf32, #tpu.memory_space<vmem>>, vector<32x128xf32>
    %cst = arith.constant dense<0.000000e+00> : vector<8x128xf32>
    %3 = tpu.matmul %1, %2, %cst {dimension_numbers = #tpu.dot_dimension_numbers<[1], [0], [0], [1], [0, 0, 1, 1], [], []>} : vector<8x32xf32>, vector<32x128xf32>, vector<8x128xf32> -> vector<8x128xf32>
    %4 = vector.extract_strided_slice %0 {offsets = [0, 0], sizes = [1, 128], strides = [1, 1]} : vector<3x128xf32> to vector<1x128xf32>
    %5 = vector.broadcast %4 : vector<1x128xf32> to vector<8x128xf32>
    %6 = arith.addf %3, %5 : vector<8x128xf32>
    %cst_5 = arith.constant 0.000000e+00 : f32
    %7 = vector.broadcast %cst_5 : f32 to vector<8x128xf32>
    %8 = arith.maximumf %6, %7 : vector<8x128xf32>
    %c0_6 = arith.constant 0 : index
    %c0_7 = arith.constant 0 : index
    %9 = vector.load %arg3[%c0_6, %c0_7] : memref<128x128xf32, #tpu.memory_space<vmem>>, vector<128x128xf32>
    %cst_8 = arith.constant dense<0.000000e+00> : vector<8x128xf32>
    %10 = tpu.matmul %8, %9, %cst_8 {dimension_numbers = #tpu.dot_dimension_numbers<[1], [0], [0], [1], [0, 0, 1, 1], [], []>} : vector<8x128xf32>, vector<128x128xf32>, vector<8x128xf32> -> vector<8x128xf32>
    %11 = vector.extract_strided_slice %0 {offsets = [1, 0], sizes = [1, 128], strides = [1, 1]} : vector<3x128xf32> to vector<1x128xf32>
    %12 = vector.broadcast %11 : vector<1x128xf32> to vector<8x128xf32>
    %13 = arith.addf %10, %12 : vector<8x128xf32>
    %cst_9 = arith.constant 0.000000e+00 : f32
    %14 = vector.broadcast %cst_9 : f32 to vector<8x128xf32>
    %15 = arith.maximumf %13, %14 : vector<8x128xf32>
    %c0_10 = arith.constant 0 : index
    %c0_11 = arith.constant 0 : index
    %16 = vector.load %arg4[%c0_10, %c0_11] : memref<128x16xf32, #tpu.memory_space<vmem>>, vector<128x16xf32>
    %cst_12 = arith.constant dense<0.000000e+00> : vector<8x16xf32>
    %17 = tpu.matmul %15, %16, %cst_12 {dimension_numbers = #tpu.dot_dimension_numbers<[1], [0], [0], [1], [0, 0, 1, 1], [], []>} : vector<8x128xf32>, vector<128x16xf32>, vector<8x16xf32> -> vector<8x16xf32>
    %18 = vector.extract_strided_slice %0 {offsets = [2, 0], sizes = [1, 16], strides = [1, 1]} : vector<3x128xf32> to vector<1x16xf32>
    %19 = vector.broadcast %18 : vector<1x16xf32> to vector<8x16xf32>
    %20 = arith.addf %17, %19 : vector<8x16xf32>
    %c0_13 = arith.constant 0 : index
    %c0_14 = arith.constant 0 : index
    %21 = vector.load %arg6[%c0_13, %c0_14] : memref<8x16xf32, #tpu.memory_space<vmem>>, vector<8x16xf32>
    tpu.vector_store %arg6[%c0_13, %c0_14], %20 {strides = array<i32>} : memref<8x16xf32, #tpu.memory_space<vmem>>, vector<8x16xf32>,
    return
  }
  func.func @transform_0(%arg0: i32) -> (i32, i32) {
    %c0_i32 = arith.constant 0 : i32
    %c0_i32_0 = arith.constant 0 : i32
    return %arg0, %c0_i32 : i32, i32
  }
  func.func @transform_1(%arg0: i32) -> (i32, i32) {
    %c0_i32 = arith.constant 0 : i32
    %c0_i32_0 = arith.constant 0 : i32
    %c0_i32_1 = arith.constant 0 : i32
    return %c0_i32, %c0_i32_0 : i32, i32
  }
  func.func @transform_2(%arg0: i32) -> (i32, i32) {
    %c0_i32 = arith.constant 0 : i32
    %c0_i32_0 = arith.constant 0 : i32
    %c0_i32_1 = arith.constant 0 : i32
    return %c0_i32, %c0_i32_0 : i32, i32
  }
  func.func @transform_3(%arg0: i32) -> (i32, i32) {
    %c0_i32 = arith.constant 0 : i32
    %c0_i32_0 = arith.constant 0 : i32
    %c0_i32_1 = arith.constant 0 : i32
    return %c0_i32, %c0_i32_0 : i32, i32
  }
  func.func @transform_4(%arg0: i32) -> (i32, i32) {
    %c0_i32 = arith.constant 0 : i32
    %c0_i32_0 = arith.constant 0 : i32
    %c0_i32_1 = arith.constant 0 : i32
    return %c0_i32, %c0_i32_0 : i32, i32
  }
  func.func @transform_5(%arg0: i32) -> (i32, i32) {
    %c0_i32 = arith.constant 0 : i32
    %c0_i32_0 = arith.constant 0 : i32
    return %arg0, %c0_i32 : i32, i32
  }
}

</mosaic_0001>

<bundles_post_ra>
// kernel: modality_encoder_forward.1
= control target key start
LH: loop header
LB: loop body
LE: loop exit
PB: predicated region body
PF: predicated region fallthrough
CT: control target
= control target key end

     0   :  { %10 = vsyncpa [#allocation3], 0  ;;  %s362_s0 = inlined_call_operand.vmem [shape: f32[8,32], index: 0, kind: input, shape index: {}]   ;;  %s363_s1 = inlined_call_operand.hbm [shape: f32[32,128], index: 1, kind: input, shape index: {}]   ;;  %s364_s2 = inlined_call_operand.vmem [shape: f32[128,128], index: 2, kind: input, shape index: {}]   ;;  %s365_s3 = inlined_call_operand.vmem [shape: f32[128,16], index: 3, kind: input, shape index: {}]   ;;  %s366_s4 = inlined_call_operand.vmem [shape: f32[3,128], index: 4, kind: input, shape index: {}]   ;;  %s367_s5 = inlined_call_operand.hbm [shape: f32[8,16], index: 5, kind: output, shape index: {}]  }
   0x1   :  { %11 = vsyncpa [#allocation4], 0  ;;  %s18_s20 = sshll.u32 %s363_s1, 4  ;;  %s220_s21 = smov [#allocation2]   ;;  %s19_s20 = int_to_ptr.hbm [resolvable:$true] %s18_s20 }
   0x2   :  { %s20_s22 = sshll.u32 %s220_s21, 4  ;;  %s221_s23 = smov 128   ;;  %s21_s22 = int_to_ptr.vmem [resolvable:$true] %s20_s22 }
   0x3   :  { %s222_s24 = smov 8  }
   0x4   :  { %26 = dma.hbm_to_vmem [thread:$0]  %s19_s20, 512, %s21_s22, [#allocation3], %s221_s23, %s221_s23, %s222_s24  }
   0x5   :  { %216 = dma.done.wait [#allocation3], 512  }
   0x6   :  { %217 = vsyncadd [#allocation3], 4294966784  ;;  %v42_v0 = vld [vmem:[#allocation2 + $0x18] sm:$0xff]  ;;  %v41_v1 = vld [vmem:[#allocation2 + $0x10] sm:$0xff]  ;;  %vm44_vm0 = vcmask 261120   ;;  %s223_s11 = smov [#allocation5]  }
   0x7   :  { %60 = vmatpush.msra.mxu0 %v42_v0  ;;  %v84_v2 = vld [vmem:[%s364_s2 + $0x78] sm:$0xff]  ;;  %v40_v3 = vld [vmem:[#allocation2 + $0x8] sm:$0xff]  ;;  %v83_v4 = vld [vmem:[%s364_s2 + $0x70] sm:$0xff]  ;;  %s151_s12 = sshll.u32 %s223_s11, 4  ;;  %vm144_vm1 = vcmask 130048   ;;  %s152_s12 = int_to_ptr.vmem [resolvable:$true] %s151_s12 }
   0x8   :  { %86 = vmatpush.msra.mxu1 %v84_v2  ;;  %v82_v5 = vld [vmem:[%s364_s2 + $0x68] sm:$0xff]  ;;  %v39_v6 = vld [vmem:[#allocation2] sm:$0xff]  ;;  %v80_v9 = vld [vmem:[%s364_s2 + $0x58] sm:$0xff] }
   0x9   :  { %61 = vmatpush.msra.mxu0 %v41_v1  ;;  %v38_v7 = vld [vmem:[%s362_s0] sm:$0xff]  ;;  %v79_v10 = vld [vmem:[%s364_s2 + $0x50] sm:$0xff]  ;;  %v78_v11 = vld [vmem:[%s364_s2 + $0x48] sm:$0xff]  ;;  %s153_s0 = sshll.u32 %s367_s5, 4  ;;  %s154_s0 = int_to_ptr.hbm [resolvable:$true] %s153_s0 }
   0xa   :  { %87 = vmatpush.msra.mxu1 %v83_v4  ;;  %v81_v8 = vld [vmem:[%s364_s2 + $0x60] sm:$0xff]  ;;  %v76_v13 = vld [vmem:[%s364_s2 + $0x38] sm:$0xff]  ;;  %v75_v14 = vld [vmem:[%s364_s2 + $0x30] sm:$0xff] }
   0xb   :  { %62 = vmatpush.msra.mxu0 %v40_v3  ;;  %v77_v12 = vld [vmem:[%s364_s2 + $0x40] sm:$0xff]  ;;  %v74_v15 = vld [vmem:[%s364_s2 + $0x28] sm:$0xff]  ;;  %v72_v17 = vld [vmem:[%s364_s2 + $0x18] sm:$0xff] }
   0xc   :  { %88 = vmatpush.msra.mxu1 %v82_v5  ;;  %v73_v16 = vld [vmem:[%s364_s2 + $0x20] sm:$0xff]  ;;  %v71_v18 = vld [vmem:[%s364_s2 + $0x10] sm:$0xff]  ;;  %v70_v19 = vld [vmem:[%s364_s2 + $0x8] sm:$0xff] }
   0xd   :  { %63 = vmatpush.msra.mxu0 %v39_v6  ;;  %v69_v20 = vld [vmem:[%s364_s2] sm:$0xff]  ;;  %v122_v21 = vld [vmem:[%s365_s3 + $0x78] sm:$0xff]  ;;  %v121_v22 = vld [vmem:[%s365_s3 + $0x70] sm:$0xff] }
   0xe   :  { %163 = vmatmul.msk.f32.vlgmr.msra.gmra.mxu0 %vm44_vm0, %v38_v7  ;;  %89 = vmatpush.msra.mxu1 %v81_v8  ;;  %v120_v23 = vld [vmem:[%s365_s3 + $0x68] sm:$0xff]  ;;  %v119_v24 = vld [vmem:[%s365_s3 + $0x60] sm:$0xff]  ;;  %v118_v25 = vld [vmem:[%s365_s3 + $0x58] sm:$0xff] }
   0xf   :  { %124 = vmatpush.msra.mxu2 %v122_v21  ;;  %v117_v26 = vld [vmem:[%s365_s3 + $0x50] sm:$0xff]  ;;  %v116_v27 = vld [vmem:[%s365_s3 + $0x48] sm:$0xff]  ;;  %v115_v28 = vld [vmem:[%s365_s3 + $0x40] sm:$0xff] }
  0x10   :  { %90 = vmatpush.msra.mxu1 %v80_v9  ;;  %v114_v29 = vld [vmem:[%s365_s3 + $0x38] sm:$0xff]  ;;  %v113_v30 = vld [vmem:[%s365_s3 + $0x30] sm:$0xff]  ;;  %v112_v31 = vld [vmem:[%s365_s3 + $0x28] sm:$0xff] }
  0x11   :  { %125 = vmatpush.msra.mxu2 %v121_v22  ;;  %v111_v32 = vld [vmem:[%s365_s3 + $0x20] sm:$0xff]  ;;  %v110_v34 = vld [vmem:[%s365_s3 + $0x18] sm:$0xff]  ;;  %v109_v39 = vld [vmem:[%s365_s3 + $0x10] sm:$0xff] }
  0x12   :  { %91 = vmatpush.msra.mxu1 %v79_v10  ;;  %v37_v33 = vld [vmem:[%s366_s4] sm:$0x7]  ;;  %v108_v40 = vld [vmem:[%s365_s3 + $0x8] sm:$0xff] }
  0x13   :  { %126 = vmatpush.msra.mxu2 %v120_v23  ;;  %v43_v35 = vperm.slane %v37_v33, 0  ;;  %v107_v41 = vld [vmem:[%s365_s3] sm:$0xff]  ;;  %v85_v42 = vperm.slane %v37_v33, 1  ;;  %v123_v46 = vperm.slane %v37_v33, 2 }
  0x14   :  { %92 = vmatpush.msra.mxu1 %v78_v11 }
  0x15   :  { %127 = vmatpush.msra.mxu2 %v119_v24 }
  0x16   :  { %93 = vmatpush.msra.mxu1 %v77_v12 }
  0x17   :  { %128 = vmatpush.msra.mxu2 %v118_v25 }
  0x18   :  { %94 = vmatpush.msra.mxu1 %v76_v13 }
  0x19   :  { %129 = vmatpush.msra.mxu2 %v117_v26 }
  0x1a   :  { %95 = vmatpush.msra.mxu1 %v75_v14 }
  0x1b   :  { %130 = vmatpush.msra.mxu2 %v116_v27 }
  0x1c   :  { %96 = vmatpush.msra.mxu1 %v74_v15 }
  0x1d   :  { %131 = vmatpush.msra.mxu2 %v115_v28 }
  0x1e   :  { %97 = vmatpush.msra.mxu1 %v73_v16 }
  0x1f   :  { %132 = vmatpush.msra.mxu2 %v114_v29 }
  0x20   :  { %98 = vmatpush.msra.mxu1 %v72_v17 }
  0x21   :  { %133 = vmatpush.msra.mxu2 %v113_v30 }
  0x22   :  { %99 = vmatpush.msra.mxu1 %v71_v18 }
  0x23   :  { %134 = vmatpush.msra.mxu2 %v112_v31 }
  0x24   :  { %100 = vmatpush.msra.mxu1 %v70_v19 }
  0x25   :  { %135 = vmatpush.msra.mxu2 %v111_v32 }
  0x26   :  { %101 = vmatpush.msra.mxu1 %v69_v20 }
  0x27   :  { %136 = vmatpush.msra.mxu2 %v110_v34 }
  0x29   :  { %137 = vmatpush.msra.mxu2 %v109_v39 }
  0x2b   :  { %138 = vmatpush.msra.mxu2 %v108_v40 }
  0x2d   :  { %139 = vmatpush.msra.mxu2 %v107_v41 }
  0x8b   :  { %v65_v36 = vpop.f32.mrf.mxu0 }
  0x8c   :  { %v66_v37 = vadd.f32 %v65_v36, %v43_v35 }
  0x8e   :  { %v68_v38 = vmax.f32 %v66_v37, 0.0 }
  0x90   :  { %102 = vmatmul.f32.vlgmr.msra.gmra.mxu1 %v68_v38 }
 0x10d   :  { %v103_v43 = vpop.f32.mrf.mxu1 }
 0x10e   :  { %v104_v44 = vadd.f32 %v103_v43, %v85_v42 }
 0x110   :  { %v106_v45 = vmax.f32 %v104_v44, 0.0 }
 0x112   :  { %140 = vmatmul.f32.vlgmr.msra.gmra.mxu2 %v106_v45 }
 0x195   :  { %v141_v47 = vpop.f32.mrf.mxu2 }
 0x196   :  { %v142_v48 = vadd.f32 %v141_v47, %v123_v46 }
 0x198   :  { %145 = vst.msk [vmem:[#allocation5] sm:$0xff] %vm144_vm1, %v142_v48 }
 0x199   :  { %156 = dma.vmem_to_hbm [thread:$0]  %s152_s12, 128, %s154_s0, [#allocation4]  }
 0x19a   :  { %218 = dma.done.wait [#allocation4], 128  }
 0x19b   :  { %219 = vsyncadd [#allocation4], 4294967168 }
 0x19c   :  { %161 = vsyncpa [#allocation3], 1 }
 0x19d   :  { %162 = vsyncpa [#allocation4], 1 }

// kernel: modality_encoder_forward.1
= control target key start
LH: loop header
LB: loop body
LE: loop exit
PB: predicated region body
PF: predicated region fallthrough
CT: control target
= control target key end

     0   :  { %10 = vsyncpa [#allocation3], 0  ;;  %s362_s0 = inlined_call_operand.vmem [shape: f32[8,32], index: 0, kind: input, shape index: {}]   ;;  %s363_s1 = inlined_call_operand.hbm [shape: f32[32,128], index: 1, kind: input, shape index: {}]   ;;  %s364_s2 = inlined_call_operand.vmem [shape: f32[128,128], index: 2, kind: input, shape index: {}]   ;;  %s365_s3 = inlined_call_operand.vmem [shape: f32[128,16], index: 3, kind: input, shape index: {}]   ;;  %s366_s4 = inlined_call_operand.vmem [shape: f32[3,128], index: 4, kind: input, shape index: {}]   ;;  %s367_s5 = inlined_call_operand.hbm [shape: f32[8,16], index: 5, kind: output, shape index: {}]  }
   0x1   :  { %11 = vsyncpa [#allocation4], 0  ;;  %s18_s20 = sshll.u32 %s363_s1, 4  ;;  %s220_s21 = smov [#allocation2]   ;;  %s19_s20 = int_to_ptr.hbm [resolvable:$true] %s18_s20 }
   0x2   :  { %s20_s22 = sshll.u32 %s220_s21, 4  ;;  %s221_s23 = smov 128   ;;  %s21_s22 = int_to_ptr.vmem [resolvable:$true] %s20_s22 }
   0x3   :  { %s222_s24 = smov 8  }
   0x4   :  { %26 = dma.hbm_to_vmem [thread:$0]  %s19_s20, 512, %s21_s22, [#allocation3], %s221_s23, %s221_s23, %s222_s24  }
   0x5   :  { %216 = dma.done.wait [#allocation3], 512  }
   0x6   :  { %217 = vsyncadd [#allocation3], 4294966784  ;;  %v42_v0 = vld [vmem:[#allocation2 + $0x18] sm:$0xff]  ;;  %v41_v1 = vld [vmem:[#allocation2 + $0x10] sm:$0xff]  ;;  %vm44_vm0 = vcmask 261120   ;;  %s223_s11 = smov [#allocation5]  }
   0x7   :  { %60 = vmatpush.msra.mxu0 %v42_v0  ;;  %v84_v2 = vld [vmem:[%s364_s2 + $0x78] sm:$0xff]  ;;  %v40_v3 = vld [vmem:[#allocation2 + $0x8] sm:$0xff]  ;;  %v83_v4 = vld [vmem:[%s364_s2 + $0x70] sm:$0xff]  ;;  %s151_s12 = sshll.u32 %s223_s11, 4  ;;  %vm144_vm1 = vcmask 130048   ;;  %s152_s12 = int_to_ptr.vmem [resolvable:$true] %s151_s12 }
   0x8   :  { %86 = vmatpush.msra.mxu1 %v84_v2  ;;  %v82_v5 = vld [vmem:[%s364_s2 + $0x68] sm:$0xff]  ;;  %v39_v6 = vld [vmem:[#allocation2] sm:$0xff]  ;;  %v80_v9 = vld [vmem:[%s364_s2 + $0x58] sm:$0xff] }
   0x9   :  { %61 = vmatpush.msra.mxu0 %v41_v1  ;;  %v38_v7 = vld [vmem:[%s362_s0] sm:$0xff]  ;;  %v79_v10 = vld [vmem:[%s364_s2 + $0x50] sm:$0xff]  ;;  %v78_v11 = vld [vmem:[%s364_s2 + $0x48] sm:$0xff]  ;;  %s153_s0 = sshll.u32 %s367_s5, 4  ;;  %s154_s0 = int_to_ptr.hbm [resolvable:$true] %s153_s0 }
   0xa   :  { %87 = vmatpush.msra.mxu1 %v83_v4  ;;  %v81_v8 = vld [vmem:[%s364_s2 + $0x60] sm:$0xff]  ;;  %v76_v13 = vld [vmem:[%s364_s2 + $0x38] sm:$0xff]  ;;  %v75_v14 = vld [vmem:[%s364_s2 + $0x30] sm:$0xff] }
   0xb   :  { %62 = vmatpush.msra.mxu0 %v40_v3  ;;  %v77_v12 = vld [vmem:[%s364_s2 + $0x40] sm:$0xff]  ;;  %v74_v15 = vld [vmem:[%s364_s2 + $0x28] sm:$0xff]  ;;  %v72_v17 = vld [vmem:[%s364_s2 + $0x18] sm:$0xff] }
   0xc   :  { %88 = vmatpush.msra.mxu1 %v82_v5  ;;  %v73_v16 = vld [vmem:[%s364_s2 + $0x20] sm:$0xff]  ;;  %v71_v18 = vld [vmem:[%s364_s2 + $0x10] sm:$0xff]  ;;  %v70_v19 = vld [vmem:[%s364_s2 + $0x8] sm:$0xff] }
   0xd   :  { %63 = vmatpush.msra.mxu0 %v39_v6  ;;  %v69_v20 = vld [vmem:[%s364_s2] sm:$0xff]  ;;  %v122_v21 = vld [vmem:[%s365_s3 + $0x78] sm:$0xff]  ;;  %v121_v22 = vld [vmem:[%s365_s3 + $0x70] sm:$0xff] }
   0xe   :  { %163 = vmatmul.msk.f32.vlgmr.msra.gmra.mxu0 %vm44_vm0, %v38_v7  ;;  %89 = vmatpush.msra.mxu1 %v81_v8  ;;  %v120_v23 = vld [vmem:[%s365_s3 + $0x68] sm:$0xff]  ;;  %v119_v24 = vld [vmem:[%s365_s3 + $0x60] sm:$0xff]  ;;  %v118_v25 = vld [vmem:[%s365_s3 + $0x58] sm:$0xff] }
   0xf   :  { %124 = vmatpush.msra.mxu2 %v122_v21  ;;  %v117_v26 = vld [vmem:[%s365_s3 + $0x50] sm:$0xff]  ;;  %v116_v27 = vld [vmem:[%s365_s3 + $0x48] sm:$0xff]  ;;  %v115_v28 = vld [vmem:[%s365_s3 + $0x40] sm:$0xff] }
  0x10   :  { %90 = vmatpush.msra.mxu1 %v80_v9  ;;  %v114_v29 = vld [vmem:[%s365_s3 + $0x38] sm:$0xff]  ;;  %v113_v30 = vld [vmem:[%s365_s3 + $0x30] sm:$0xff]  ;;  %v112_v31 = vld [vmem:[%s365_s3 + $0x28] sm:$0xff] }
  0x11   :  { %125 = vmatpush.msra.mxu2 %v121_v22  ;;  %v111_v32 = vld [vmem:[%s365_s3 + $0x20] sm:$0xff]  ;;  %v110_v34 = vld [vmem:[%s365_s3 + $0x18] sm:$0xff]  ;;  %v109_v39 = vld [vmem:[%s365_s3 + $0x10] sm:$0xff] }
  0x12   :  { %91 = vmatpush.msra.mxu1 %v79_v10  ;;  %v37_v33 = vld [vmem:[%s366_s4] sm:$0x7]  ;;  %v108_v40 = vld [vmem:[%s365_s3 + $0x8] sm:$0xff] }
  0x13   :  { %126 = vmatpush.msra.mxu2 %v120_v23  ;;  %v43_v35 = vperm.slane %v37_v33, 0  ;;  %v107_v41 = vld [vmem:[%s365_s3] sm:$0xff]  ;;  %v85_v42 = vperm.slane %v37_v33, 1  ;;  %v123_v46 = vperm.slane %v37_v33, 2 }
  0x14   :  { %92 = vmatpush.msra.mxu1 %v78_v11 }
  0x15   :  { %127 = vmatpush.msra.mxu2 %v119_v24 }
  0x16   :  { %93 = vmatpush.msra.mxu1 %v77_v12 }
  0x17   :  { %128 = vmatpush.msra.mxu2 %v118_v25 }
  0x18   :  { %94 = vmatpush.msra.mxu1 %v76_v13 }
  0x19   :  { %129 = vmatpush.msra.mxu2 %v117_v26 }
  0x1a   :  { %95 = vmatpush.msra.mxu1 %v75_v14 }
  0x1b   :  { %130 = vmatpush.msra.mxu2 %v116_v27 }
  0x1c   :  { %96 = vmatpush.msra.mxu1 %v74_v15 }
  0x1d   :  { %131 = vmatpush.msra.mxu2 %v115_v28 }
  0x1e   :  { %97 = vmatpush.msra.mxu1 %v73_v16 }
  0x1f   :  { %132 = vmatpush.msra.mxu2 %v114_v29 }
  0x20   :  { %98 = vmatpush.msra.mxu1 %v72_v17 }
  0x21   :  { %133 = vmatpush.msra.mxu2 %v113_v30 }
  0x22   :  { %99 = vmatpush.msra.mxu1 %v71_v18 }
  0x23   :  { %134 = vmatpush.msra.mxu2 %v112_v31 }
  0x24   :  { %100 = vmatpush.msra.mxu1 %v70_v19 }
  0x25   :  { %135 = vmatpush.msra.mxu2 %v111_v32 }
  0x26   :  { %101 = vmatpush.msra.mxu1 %v69_v20 }
  0x27   :  { %136 = vmatpush.msra.mxu2 %v110_v34 }
  0x29   :  { %137 = vmatpush.msra.mxu2 %v109_v39 }
  0x2b   :  { %138 = vmatpush.msra.mxu2 %v108_v40 }
  0x2d   :  { %139 = vmatpush.msra.mxu2 %v107_v41 }
  0x8b   :  { %v65_v36 = vpop.f32.mrf.mxu0 }
  0x8c   :  { %v66_v37 = vadd.f32 %v65_v36, %v43_v35 }
  0x8e   :  { %v68_v38 = vmax.f32 %v66_v37, 0.0 }
  0x90   :  { %102 = vmatmul.f32.vlgmr.msra.gmra.mxu1 %v68_v38 }
 0x10d   :  { %v103_v43 = vpop.f32.mrf.mxu1 }
 0x10e   :  { %v104_v44 = vadd.f32 %v103_v43, %v85_v42 }
 0x110   :  { %v106_v45 = vmax.f32 %v104_v44, 0.0 }
 0x112   :  { %140 = vmatmul.f32.vlgmr.msra.gmra.mxu2 %v106_v45 }
 0x195   :  { %v141_v47 = vpop.f32.mrf.mxu2 }
 0x196   :  { %v142_v48 = vadd.f32 %v141_v47, %v123_v46 }
 0x198   :  { %145 = vst.msk [vmem:[#allocation5] sm:$0xff] %vm144_vm1, %v142_v48 }
 0x199   :  { %156 = dma.vmem_to_hbm [thread:$0]  %s152_s12, 128, %s154_s0, [#allocation4]  }
 0x19a   :  { %218 = dma.done.wait [#allocation4], 128  }
 0x19b   :  { %219 = vsyncadd [#allocation4], 4294967168 }
 0x19c   :  { %161 = vsyncpa [#allocation3], 1 }
 0x19d   :  { %162 = vsyncpa [#allocation4], 1 }

</bundles_post_ra>
